<compile_context>
chip_gen: v7x
topology: tpu7x:2x2x1
jax: 0.10.0
libtpu: 0.0.40
codegen_flags: <defaults>
</compile_context>

<pallas_src>
import jax
import jax.numpy as jnp
from jax.experimental import pallas as pl
from jax.experimental.pallas import tpu as pltpu

TETRA_PERMS = (
    (0, 1, 2, 3), (0, 2, 3, 1), (0, 3, 1, 2),
    (1, 0, 3, 2), (1, 2, 0, 3), (1, 3, 2, 0),
    (2, 0, 1, 3), (2, 1, 3, 0), (2, 3, 0, 1),
    (3, 0, 2, 1), (3, 1, 0, 2), (3, 2, 1, 0),
)
NPERM = len(TETRA_PERMS)


def _tetra_kernel(x_ref, wall_ref, ball_ref, w1s_ref, b1_ref, w2_ref, b2_ref, o_ref):
    # x_ref: [TN, 4H] f32; wall_ref: [4H, 12H] bf16; w1s_ref: [12H, H] bf16.
    xb = x_ref[...].astype(jnp.bfloat16)
    # One lane-dense, full-K matmul yields all 12 permuted Linear outputs side
    # by side along the lane dimension.
    z = jnp.dot(xb, wall_ref[...], preferred_element_type=jnp.float32)   # [TN, 12H]
    z = jnp.maximum(z + ball_ref[...], 0.0)                              # wide ReLU
    # Dropout(p=0.2) is identity in eval mode.
    # 12-perm sum, /3, first mlp_out Linear and eval BatchNorm are all folded
    # into w1s = tile(W1 * bn_scale / 3, 12), so no lane-block reduce is needed.
    h = jnp.dot(z.astype(jnp.bfloat16), w1s_ref[...],
                preferred_element_type=jnp.float32) + b1_ref[...]
    h = jnp.maximum(h, 0.0)
    out = jnp.dot(h.astype(jnp.bfloat16), w2_ref[...],
                  preferred_element_type=jnp.float32) + b2_ref[...]
    o_ref[...] = out.astype(o_ref.dtype)


def _vmem_budget_bytes():
    """Generation-aware working-set budget (stays under default scoped VMEM)."""
    try:
        cap = int(pltpu.get_tpu_info().vmem_capacity_bytes)
    except Exception:  # no TPU info available at trace time
        cap = 64 * 1024 * 1024
    return max(2 * 1024 * 1024, min(8 * 1024 * 1024, cap // 8))


def _auto_tile_n(N, H, budget):
    # ~bytes/row of per-step VMEM: double-buffered f32 x block (32H), wide z in
    # f32 + bf16 copy + ReLU temporaries (~120H), mlp temporaries (~14H),
    # double-buffered f32 output (8H).
    per_row = 176 * H + 64
    tn = budget // per_row
    tn = max(16, min(2048, (tn // 32) * 32))        # multiple of 32 (bf16 sublanes)
    # Guarantee >= 2 grid steps when N allows it (v7x megacore, DMA overlap)
    # and never blow the tile far past the input size.
    half_up = max(16, ((-(-N // 2)) + 15) // 16 * 16)
    tn = min(tn, half_up)
    return int(tn)


def concat_tetra_permuter(x, params, *, tile_n=None):
    """x: [N, 4, H] float32. Returns [N, H] float32."""
    N, four, H = x.shape
    assert four == 4
    wbs, bbs, w1, b1, bn_scale, bn_shift, w2, b2 = params

    if tile_n is None:
        tile_n = _auto_tile_n(N, H, _vmem_budget_bytes())
    grid_n = pl.cdiv(N, tile_n)

    # ---- host-side weight prep (tiny; done once, outside the kernel) ----
    # Bake the 12 static permutations into W_all [4H, 12H]:
    #   W_all[k*H:(k+1)*H, p*H:(p+1)*H] = W_bs^T block of the position that
    #   neighbour slot k occupies in permutation p.
    blocks = wbs.reshape(4, H, H)                                     # [4, H, H]
    idx = jnp.asarray([[TETRA_PERMS[p].index(k) for p in range(NPERM)]
                       for k in range(4)], dtype=jnp.int32)           # [4, 12]
    w_all = jnp.transpose(blocks[idx], (0, 2, 1, 3)).reshape(4 * H, NPERM * H)
    w_all = w_all.astype(jnp.bfloat16)
    b_all = jnp.tile(bbs.astype(jnp.float32), (1, NPERM))             # [1, 12H]
    # Fold 12-perm sum, /3 and eval-mode BatchNorm into the first mlp Linear.
    w1s = jnp.tile(w1 * bn_scale * (1.0 / 3.0), (NPERM, 1)).astype(jnp.bfloat16)
    b1f = (b1 * bn_scale + bn_shift).astype(jnp.float32)
    w2b = w2.astype(jnp.bfloat16)
    b2f = b2.astype(jnp.float32)

    # x only needs a free reshape [N,4,H] -> [N,4H]: no transpose / pad / cast
    # pass over x in HBM.  bf16 cast happens in-kernel; ragged N is handled by
    # Pallas partial trailing blocks (garbage rows are masked on store).
    x2d = x.reshape(N, 4 * H)

    full = lambda shape: pl.BlockSpec(shape, lambda i: tuple(0 for _ in shape))

    flops = int(N) * 122 * H * H                      # 2*(4H*12H + 12H*H + H*H)
    bytes_accessed = int(N) * 20 * H + 122 * H * H + 64 * H

    out = pl.pallas_call(
        _tetra_kernel,
        out_shape=jax.ShapeDtypeStruct((N, H), jnp.float32),
        grid_spec=pltpu.PrefetchScalarGridSpec(
            num_scalar_prefetch=0,
            grid=(grid_n,),
            in_specs=[
                pl.BlockSpec((tile_n, 4 * H), lambda i: (i, 0)),  # x rows (f32)
                full((4 * H, NPERM * H)),   # W_all (perm-baked W_bs, bf16)
                full((1, NPERM * H)),       # b_bs tiled x12
                full((NPERM * H, H)),       # W1 (perm-sum + /3 + BN folded, bf16)
                full((1, H)),               # b1 (BN folded)
                full((H, H)),               # W2 (bf16)
                full((1, H)),               # b2
            ],
            out_specs=pl.BlockSpec((tile_n, H), lambda i: (i, 0)),
        ),
        compiler_params=pltpu.CompilerParams(
            dimension_semantics=("parallel",)),
        cost_estimate=pl.CostEstimate(
            flops=flops, transcendentals=0, bytes_accessed=bytes_accessed),
    )(x2d, w_all, b_all, w1s, b1f, w2b, b2f)
    return out


def init_params(key, hidden):
    """Deterministic synthetic parameters (shapes from the module __init__)."""
    k = jax.random.split(key, 6)
    # W_bs: Linear(4H -> H), xavier_normal; stored pre-transposed [4H, H].
    std_bs = (2.0 / (4 * hidden + hidden)) ** 0.5
    wbs = jax.random.normal(k[0], (4 * hidden, hidden), jnp.float32) * std_bs
    bbs = jax.random.normal(k[1], (1, hidden), jnp.float32) * 0.01
    # mlp_out Linear(H,H) x2, stored pre-transposed [H, H].
    std_h = (1.0 / hidden) ** 0.5
    w1 = jax.random.normal(k[2], (hidden, hidden), jnp.float32) * std_h
    b1 = jax.random.normal(k[3], (1, hidden), jnp.float32) * 0.01
    w2 = jax.random.normal(k[4], (hidden, hidden), jnp.float32) * std_h
    b2 = jax.random.normal(k[5], (1, hidden), jnp.float32) * 0.01
    # BatchNorm1d eval-mode: gamma=1, beta=0, running_mean=0, running_var=1.
    eps = 1e-5
    gamma = jnp.ones((1, hidden), jnp.float32)
    beta = jnp.zeros((1, hidden), jnp.float32)
    running_mean = jnp.zeros((1, hidden), jnp.float32)
    running_var = jnp.ones((1, hidden), jnp.float32)
    bn_scale = gamma / jnp.sqrt(running_var + eps)
    bn_shift = beta - running_mean * bn_scale
    return (wbs, bbs, w1, b1, bn_scale, bn_shift, w2, b2)


def reference(x, params):
    """Pure-JAX reference mirroring the PyTorch forward (eval mode) with the
    same bf16 weight/activation rounding points the kernel applies."""
    wbs, bbs, w1, b1, bn_scale, bn_shift, w2, b2 = params
    N, _, H = x.shape
    bf = lambda a: a.astype(jnp.bfloat16).astype(jnp.float32)
    perms = jnp.asarray(TETRA_PERMS, dtype=jnp.int32)              # [12, 4]
    xp = bf(x)[:, perms, :].reshape(N, NPERM, 4 * H)               # [N, 12, 4H]
    nei = jax.nn.relu(
        jnp.einsum("npk,kh->nph", xp, bf(wbs),
                   preferred_element_type=jnp.float32) + bbs[None])
    w1s = bf(w1 * bn_scale * (1.0 / 3.0))
    b1f = b1 * bn_scale + bn_shift
    h = jax.nn.relu(
        jnp.einsum("nph,hd->nd", bf(nei), w1s,
                   preferred_element_type=jnp.float32) + b1f)
    return bf(h) @ bf(w2) + b2


if __name__ == "__main__":
    hidden = 32
    N = 64                      # number of tetra centers
    key = jax.random.PRNGKey(0)
    kx, kp = jax.random.split(key)

    x = jax.random.normal(kx, (N, 4, hidden), jnp.float32)
    params = init_params(kp, hidden)

    fn = jax.jit(lambda xx: concat_tetra_permuter(xx, params))
    out = jax.block_until_ready(fn(x))

    ref = reference(x, params)
    assert out.shape == (N, hidden)
    err = float(jnp.max(jnp.abs(out - ref)))
    assert jnp.allclose(out, ref, atol=2e-3, rtol=2e-3), f"max abs err {err}"
    print("KERNEL_OK")
</pallas_src>

<mosaic_0001>
module attributes {stable_mosaic.version = 11 : i64} {
  func.func @_tetra_kernel(%arg0: i32, %arg1: memref<32x128xf32, #tpu.memory_space<vmem>>, %arg2: memref<128x384xbf16, #tpu.memory_space<vmem>>, %arg3: memref<1x384xf32, #tpu.memory_space<vmem>>, %arg4: memref<384x32xbf16, #tpu.memory_space<vmem>>, %arg5: memref<1x32xf32, #tpu.memory_space<vmem>>, %arg6: memref<32x32xbf16, #tpu.memory_space<vmem>>, %arg7: memref<1x32xf32, #tpu.memory_space<vmem>>, %arg8: memref<32x32xf32, #tpu.memory_space<vmem>>) attributes {dimension_semantics = [#tpu.dimension_semantics<parallel>], iteration_bounds = array<i64: 2>, scalar_prefetch = 0 : i64, scratch_operands = 0 : i64, tpu.core_type = #tpu.core_type<tc>, window_params = [{transform_indices = @transform_0, window_bounds = array<i64: 32, 128>}, {pipeline_mode = #tpu.pipeline_mode<synchronous>, transform_indices = @transform_1, window_bounds = array<i64: 128, 384>}, {pipeline_mode = #tpu.pipeline_mode<synchronous>, transform_indices = @transform_2, window_bounds = array<i64: 1, 384>}, {pipeline_mode = #tpu.pipeline_mode<synchronous>, transform_indices = @transform_3, window_bounds = array<i64: 384, 32>}, {pipeline_mode = #tpu.pipeline_mode<synchronous>, transform_indices = @transform_4, window_bounds = array<i64: 1, 32>}, {pipeline_mode = #tpu.pipeline_mode<synchronous>, transform_indices = @transform_5, window_bounds = array<i64: 32, 32>}, {pipeline_mode = #tpu.pipeline_mode<synchronous>, transform_indices = @transform_6, window_bounds = array<i64: 1, 32>}, {transform_indices = @transform_7, window_bounds = array<i64: 32, 32>}]} {
    %c0 = arith.constant 0 : index
    %c0_0 = arith.constant 0 : index
    %0 = vector.load %arg1[%c0, %c0_0] : memref<32x128xf32, #tpu.memory_space<vmem>>, vector<32x128xf32>
    %1 = arith.truncf %0 : vector<32x128xf32> to vector<32x128xbf16>
    %c0_1 = arith.constant 0 : index
    %c0_2 = arith.constant 0 : index
    %2 = vector.load %arg2[%c0_1, %c0_2] : memref<128x384xbf16, #tpu.memory_space<vmem>>, vector<128x384xbf16>
    %cst = arith.constant dense<0.000000e+00> : vector<32x384xf32>
    %3 = tpu.matmul %1, %2, %cst {dimension_numbers = #tpu.dot_dimension_numbers<[1], [0], [0], [1], [0, 0, 1, 1], [], []>} : vector<32x128xbf16>, vector<128x384xbf16>, vector<32x384xf32> -> vector<32x384xf32>
    %c0_3 = arith.constant 0 : index
    %c0_4 = arith.constant 0 : index
    %4 = vector.load %arg3[%c0_3, %c0_4] : memref<1x384xf32, #tpu.memory_space<vmem>>, vector<1x384xf32>
    %5 = vector.broadcast %4 : vector<1x384xf32> to vector<32x384xf32>
    %6 = arith.addf %3, %5 : vector<32x384xf32>
    %cst_5 = arith.constant 0.000000e+00 : f32
    %7 = vector.broadcast %cst_5 : f32 to vector<32x384xf32>
    %8 = arith.maximumf %6, %7 : vector<32x384xf32>
    %9 = arith.truncf %8 : vector<32x384xf32> to vector<32x384xbf16>
    %c0_6 = arith.constant 0 : index
    %c0_7 = arith.constant 0 : index
    %10 = vector.load %arg4[%c0_6, %c0_7] : memref<384x32xbf16, #tpu.memory_space<vmem>>, vector<384x32xbf16>
    %cst_8 = arith.constant dense<0.000000e+00> : vector<32x32xf32>
    %11 = tpu.matmul %9, %10, %cst_8 {dimension_numbers = #tpu.dot_dimension_numbers<[1], [0], [0], [1], [0, 0, 1, 1], [], []>} : vector<32x384xbf16>, vector<384x32xbf16>, vector<32x32xf32> -> vector<32x32xf32>
    %c0_9 = arith.constant 0 : index
    %c0_10 = arith.constant 0 : index
    %12 = vector.load %arg5[%c0_9, %c0_10] : memref<1x32xf32, #tpu.memory_space<vmem>>, vector<1x32xf32>
    %13 = vector.broadcast %12 : vector<1x32xf32> to vector<32x32xf32>
    %14 = arith.addf %11, %13 : vector<32x32xf32>
    %cst_11 = arith.constant 0.000000e+00 : f32
    %15 = vector.broadcast %cst_11 : f32 to vector<32x32xf32>
    %16 = arith.maximumf %14, %15 : vector<32x32xf32>
    %17 = arith.truncf %16 : vector<32x32xf32> to vector<32x32xbf16>
    %c0_12 = arith.constant 0 : index
    %c0_13 = arith.constant 0 : index
    %18 = vector.load %arg6[%c0_12, %c0_13] : memref<32x32xbf16, #tpu.memory_space<vmem>>, vector<32x32xbf16>
    %cst_14 = arith.constant dense<0.000000e+00> : vector<32x32xf32>
    %19 = tpu.matmul %17, %18, %cst_14 {dimension_numbers = #tpu.dot_dimension_numbers<[1], [0], [0], [1], [0, 0, 1, 1], [], []>} : vector<32x32xbf16>, vector<32x32xbf16>, vector<32x32xf32> -> vector<32x32xf32>
    %c0_15 = arith.constant 0 : index
    %c0_16 = arith.constant 0 : index
    %20 = vector.load %arg7[%c0_15, %c0_16] : memref<1x32xf32, #tpu.memory_space<vmem>>, vector<1x32xf32>
    %21 = vector.broadcast %20 : vector<1x32xf32> to vector<32x32xf32>
    %22 = arith.addf %19, %21 : vector<32x32xf32>
    %c0_17 = arith.constant 0 : index
    %c0_18 = arith.constant 0 : index
    %23 = vector.load %arg8[%c0_17, %c0_18] : memref<32x32xf32, #tpu.memory_space<vmem>>, vector<32x32xf32>
    tpu.vector_store %arg8[%c0_17, %c0_18], %22 {strides = array<i32>} : memref<32x32xf32, #tpu.memory_space<vmem>>, vector<32x32xf32>,
    return
  }
  func.func @transform_0(%arg0: i32) -> (i32, i32) {
    %c0_i32 = arith.constant 0 : i32
    %c0_i32_0 = arith.constant 0 : i32
    return %arg0, %c0_i32 : i32, i32
  }
  func.func @transform_1(%arg0: i32) -> (i32, i32) {
    %c0_i32 = arith.constant 0 : i32
    %c0_i32_0 = arith.constant 0 : i32
    %c0_i32_1 = arith.constant 0 : i32
    return %c0_i32, %c0_i32_0 : i32, i32
  }
  func.func @transform_2(%arg0: i32) -> (i32, i32) {
    %c0_i32 = arith.constant 0 : i32
    %c0_i32_0 = arith.constant 0 : i32
    %c0_i32_1 = arith.constant 0 : i32
    return %c0_i32, %c0_i32_0 : i32, i32
  }
  func.func @transform_3(%arg0: i32) -> (i32, i32) {
    %c0_i32 = arith.constant 0 : i32
    %c0_i32_0 = arith.constant 0 : i32
    %c0_i32_1 = arith.constant 0 : i32
    return %c0_i32, %c0_i32_0 : i32, i32
  }
  func.func @transform_4(%arg0: i32) -> (i32, i32) {
    %c0_i32 = arith.constant 0 : i32
    %c0_i32_0 = arith.constant 0 : i32
    %c0_i32_1 = arith.constant 0 : i32
    return %c0_i32, %c0_i32_0 : i32, i32
  }
  func.func @transform_5(%arg0: i32) -> (i32, i32) {
    %c0_i32 = arith.constant 0 : i32
    %c0_i32_0 = arith.constant 0 : i32
    %c0_i32_1 = arith.constant 0 : i32
    return %c0_i32, %c0_i32_0 : i32, i32
  }
  func.func @transform_6(%arg0: i32) -> (i32, i32) {
    %c0_i32 = arith.constant 0 : i32
    %c0_i32_0 = arith.constant 0 : i32
    %c0_i32_1 = arith.constant 0 : i32
    return %c0_i32, %c0_i32_0 : i32, i32
  }
  func.func @transform_7(%arg0: i32) -> (i32, i32) {
    %c0_i32 = arith.constant 0 : i32
    %c0_i32_0 = arith.constant 0 : i32
    return %arg0, %c0_i32 : i32, i32
  }
}

</mosaic_0001>

<bundles_post_ra>
// kernel: _lambda_.1
= control target key start
LH: loop header
LB: loop body
LE: loop exit
PB: predicated region body
PF: predicated region fallthrough
CT: control target
= control target key end

     0   :  { %s1309_s24 = smov 0   ;;  %s1506_s0 = inlined_call_operand.vmem [shape: f32[64,128], index: 0, kind: input, shape index: {}]   ;;  %s1507_s1 = inlined_call_operand.vmem [shape: bf16[128,384], index: 1, kind: input, shape index: {}]   ;;  %s1508_s2 = inlined_call_operand.vmem [shape: f32[1,384], index: 2, kind: input, shape index: {}]   ;;  %s1509_s3 = inlined_call_operand.vmem [shape: bf16[384,32], index: 3, kind: input, shape index: {}]   ;;  %s1510_s4 = inlined_call_operand.vmem [shape: f32[1,32], index: 4, kind: input, shape index: {}]   ;;  %s1511_s5 = inlined_call_operand.vmem [shape: bf16[32,32], index: 5, kind: input, shape index: {}]   ;;  %s1512_s6 = inlined_call_operand.vmem [shape: f32[1,32], index: 6, kind: input, shape index: {}]   ;;  %s1513_s7 = inlined_call_operand.vmem [shape: f32[64,32], index: 7, kind: output, shape index: {}]  }
   0x1 LB: > { %s1028_s25 = sadd.s32 4294967295, %s1266_s24   ;;  %p1032_p0 = scmp.ge.s32.totalorder %s1266_s24, 1  ;;  %s1266_s24 = sphi %s1309_s24, %s17_s24  }
   0x2   : > { %p238_p1 = scmp.lt.s32.totalorder %s1266_s24, 3 }
   0x4   : > { %p239_p2 = pnand %p1032_p0, %p238_p1 }
   0x5   : > { %v1202_v0 = vld [vmem:[%s1507_s1 + $0x4] ss:$12 sps:$4 sm:$0xff] (!%p239_p2)   ;;  %s1033_s28 = sshll.u32 (!%p239_p2), %s1028_s25, 2  ;;  %v1204_v1 = vld [vmem:[%s1507_s1] ss:$12 sps:$4 sm:$0xff] (!%p239_p2)   ;;  %v1268_v2 = vmov (!%p239_p2), 0   ;;  %v323_v55 = vlaneseq (!%p239_p2) }
   0x6   : > { %242 = sbr.rel (%p239_p2) target bundleno = 711 (0x2c7), region = 48  ;;  %498 = vmatprep.mubr.bf16.mxu0 (!%p239_p2), %v1268_v2  ;;  %p271_p3 = scmp.lt.s32.totalorder (!%p239_p2), %s1033_s28, 7  ;;  %466 = vmatprep.subr.bf16.mxu0 (!%p239_p2), %v1202_v0  ;;  %v1205_v3 = vld [vmem:[%s1507_s1 + $0x1c] ss:$12 sps:$4 sm:$0xff] (!%p239_p2)   ;;  %v1208_v5 = vld [vmem:[%s1507_s1 + $0x18] ss:$12 sps:$4 sm:$0xff] (!%p239_p2)  }
   0x7   : > { %467 = vmatpush1.bf16.msra.mxu0 (!%p239_p2), %v1204_v1  ;;  %v1207_v4 = vld [vmem:[%s1507_s1 + $0x8] ss:$12 sps:$4 sm:$0xff] (!%p239_p2)   ;;  %v1211_v7 = vld [vmem:[%s1507_s1 + $0x20] ss:$12 sps:$4 sm:$0xff] (!%p239_p2)   ;;  %v1212_v8 = vld [vmem:[%s1507_s1 + $0x30] ss:$12 sps:$4 sm:$0xff] (!%p239_p2)  }
   0x8   : > { %468 = vmatprep.subr.bf16.mxu0 (!%p239_p2), %v1205_v3  ;;  %v1209_v6 = vld [vmem:[%s1507_s1 + $0x34] ss:$12 sps:$4 sm:$0xff] (!%p239_p2)   ;;  %1145 = vmatprep.subr.bf16.mxu1 (!%p239_p2), %v1207_v4  ;;  %v1215_v9 = vld [vmem:[%s1507_s1 + $0x38] ss:$12 sps:$4 sm:$0xff] (!%p239_p2)   ;;  %v1219_v12 = vld [vmem:[%s1507_s1 + $0x50] ss:$12 sps:$4 sm:$0xff] (!%p239_p2)  }
   0x9   : > { %1146 = vmatpush3.bf16.msra.mxu1 (!%p239_p2), %v1207_v4  ;;  %v1213_v10 = vld [vmem:[%s1507_s1 + $0x4c] ss:$12 sps:$4 sm:$0xff] (!%p239_p2)   ;;  %v1216_v11 = vld [vmem:[%s1507_s1 + $0x48] ss:$12 sps:$4 sm:$0xff] (!%p239_p2)   ;;  %v1217_v13 = vld [vmem:[%s1507_s1 + $0x64] ss:$12 sps:$4 sm:$0xff] (!%p239_p2)  }
   0xa   : > { %1147 = vmatprep.subr.bf16.mxu1 (!%p239_p2), %v1211_v7  ;;  %v1220_v14 = vld [vmem:[%s1507_s1 + $0x60] ss:$12 sps:$4 sm:$0xff] (!%p239_p2)   ;;  %v1223_v15 = vld [vmem:[%s1507_s1 + $0x68] ss:$12 sps:$4 sm:$0xff] (!%p239_p2)   ;;  %v1224_v19 = vld [vmem:[%s1507_s1 + $0x78] ss:$12 sps:$4 sm:$0xff] (!%p239_p2)  }
   0xb   : > { %469 = vmatpush1.bf16.msra.mxu0 (!%p239_p2), %v1208_v5  ;;  %v1221_v16 = vld [vmem:[%s1507_s1 + $0x7c] ss:$12 sps:$4 sm:$0xff] (!%p239_p2)   ;;  %v1227_v20 = vld [vmem:[%s1507_s1 + $0x80] ss:$12 sps:$4 sm:$0xff] (!%p239_p2)   ;;  %v1231_v24 = vld [vmem:[%s1507_s1 + $0x98] ss:$12 sps:$4 sm:$0xff] (!%p239_p2)  }
   0xc   : > { %470 = vmatprep.subr.bf16.mxu0 (!%p239_p2), %v1209_v6  ;;  %v1225_v22 = vld [vmem:[%s1507_s1 + $0x94] ss:$12 sps:$4 sm:$0xff] (!%p239_p2)   ;;  %v1228_v23 = vld [vmem:[%s1507_s1 + $0x90] ss:$12 sps:$4 sm:$0xff] (!%p239_p2)   ;;  %v1229_v25 = vld [vmem:[%s1507_s1 + $0xac] ss:$12 sps:$4 sm:$0xff] (!%p239_p2)  }
   0xd   : > { %s1515_s28 = smov (!%p271_p3, %s1033_s28), 7  ;;  %1148 = vmatpush3.bf16.msra.mxu1 %v1211_v7  ;;  %v1232_v26 = vld [vmem:[%s1507_s1 + $0xa8] ss:$12 sps:$4 sm:$0xff]   ;;  %v1233_v27 = vld [vmem:[%s1507_s1 + $0xb0] ss:$12 sps:$4 sm:$0xff]   ;;  %v1234_v29 = vld [vmem:[%s1509_s3 + $0x40] sm:$0xff]  }
   0xe   : > { %1149 = vmatprep.subr.bf16.mxu1 %v1215_v9  ;;  %s1034_s30 = sshll.u32 %s1515_s28, 3  ;;  %v1235_v31 = vld [vmem:[%s1509_s3] sm:$0xff]   ;;  %v1236_v32 = vld [vmem:[%s1509_s3 + $0x48] sm:$0xff]   ;;  %v1239_v37 = vld [vmem:[%s1509_s3 + $0x50] sm:$0xff]   ;;  %v324_v56 = vshrl.u32 %v323_v55, 7  ;;  %vm912_vm0 = vcmask 261120  }
   0xf   : > { %471 = vmatpush1.bf16.msra.mxu0 %v1212_v8  ;;  %s1368_s14 = scalar_lea.vmem %s1506_s0, %s1034_s30  ;;  %v1237_v33 = vld [vmem:[%s1509_s3 + $0x80] sm:$0xff]   ;;  %v1238_v35 = vld [vmem:[%s1509_s3 + $0x8] sm:$0xff]   ;;  %v1241_v38 = vld [vmem:[%s1509_s3 + $0x10] sm:$0xff]   ;;  %s280_s16 = scalar_lea.vmem %s1513_s7, %s1034_s30 }
  0x10   : > { %472 = vmatprep.subr.bf16.mxu0 %v1213_v10  ;;  %v283_v17 = vld [vmem:[%s1368_s14] sm:$0xff]  ;;  %v284_v18 = vld [vmem:[%s1368_s14 + $0x8] sm:$0xff]  ;;  %v285_v28 = vld [vmem:[%s1368_s14 + $0x10] sm:$0xff]  ;;  %v325_v57 = vsub.s32 0, %v324_v56  ;;  %v329_v59 = vsub.s32 1, %v324_v56  ;;  %v333_v60 = vsub.s32 2, %v324_v56 }
  0x11   : > { %1150 = vmatpush3.bf16.msra.mxu1 %v1215_v9  ;;  %v287_v21 = vpack.c.bf16 %v284_v18, %v283_v17  ;;  %v286_v30 = vld [vmem:[%s1368_s14 + $0x18] sm:$0xff]  ;;  %v1240_v36 = vld [vmem:[%s1509_s3 + $0x88] sm:$0xff]   ;;  %v1243_v39 = vld [vmem:[%s1509_s3 + $0x90] sm:$0xff]  }
  0x12   : > { %1151 = vmatprep.subr.bf16.mxu1 %v1219_v12  ;;  %v288_v34 = vpack.c.bf16 %v286_v30, %v285_v28  ;;  %v1242_v40 = vld [vmem:[%s1509_s3 + $0x58] sm:$0xff]   ;;  %v1245_v43 = vld [vmem:[%s1509_s3 + $0x60] sm:$0xff]   ;;  %v1248_v46 = vld [vmem:[%s1509_s3 + $0x68] sm:$0xff]  }
  0x13   : > { %473 = vmatpush1.bf16.msra.mxu0 %v1216_v11  ;;  %1161 = vmatprep.mubr.bf16.mxu1 %v287_v21  ;;  %v1244_v41 = vld [vmem:[%s1509_s3 + $0x18] sm:$0xff]   ;;  %v1247_v44 = vld [vmem:[%s1509_s3 + $0x20] sm:$0xff]   ;;  %v1250_v47 = vld [vmem:[%s1509_s3 + $0x28] sm:$0xff]  }
  0x14   : > { %474 = vmatprep.subr.bf16.mxu0 %v1217_v13  ;;  %v1246_v42 = vld [vmem:[%s1509_s3 + $0x98] sm:$0xff]   ;;  %v1249_v45 = vld [vmem:[%s1509_s3 + $0xa0] sm:$0xff]   ;;  %v1251_v48 = vld [vmem:[%s1509_s3 + $0x70] sm:$0xff]  }
  0x15   : > { %1152 = vmatpush3.bf16.msra.mxu1 %v1219_v12  ;;  %v1252_v49 = vld [vmem:[%s1509_s3 + $0xa8] sm:$0xff]   ;;  %v1253_v50 = vld [vmem:[%s1509_s3 + $0x30] sm:$0xff]   ;;  %v1254_v51 = vld [vmem:[%s1509_s3 + $0x78] sm:$0xff]  }
  0x16   : > { %1153 = vmatprep.subr.bf16.mxu1 %v1223_v15  ;;  %v1255_v52 = vld [vmem:[%s1509_s3 + $0xb0] sm:$0xff]   ;;  %v1256_v53 = vld [vmem:[%s1509_s3 + $0x38] sm:$0xff]   ;;  %v321_v58 = vld [vmem:[%s1508_s2] sm:$0x7] }
  0x17   : > { %475 = vmatpush1.bf16.msra.mxu0 %v1220_v14  ;;  %v1257_v54 = vld [vmem:[%s1509_s3 + $0xb8] sm:$0xff]   ;;  %v326_v61 = vrot.slane %v321_v58, %v325_v57  ;;  %v330_v62 = vrot.slane %v321_v58, %v329_v59  ;;  %v334_v0 = vrot.slane %v321_v58, %v333_v60 }
  0x18   : > { %476 = vmatprep.subr.bf16.mxu0 %v1221_v16 }
  0x19   : > { %1154 = vmatpush3.bf16.msra.mxu1 %v1223_v15 }
  0x1a   : > { %1155 = vmatprep.subr.bf16.mxu1 %v1227_v20 }
  0x1b   : > { %477 = vmatpush1.bf16.msra.mxu0 %v1224_v19 }
  0x1c   : > { %478 = vmatprep.subr.bf16.mxu0 %v1225_v22 }
  0x1d   : > { %1156 = vmatpush3.bf16.msra.mxu1 %v1227_v20 }
  0x1e   : > { %1157 = vmatprep.subr.bf16.mxu1 %v1231_v24 }
  0x1f   : > { %479 = vmatpush1.bf16.msra.mxu0 %v1228_v23 }
  0x20   : > { %480 = vmatprep.subr.bf16.mxu0 %v1229_v25 }
  0x21   : > { %1158 = vmatpush3.bf16.msra.mxu1 %v1231_v24 }
  0x22   : > { %1159 = vmatprep.subr.bf16.mxu1 %v1233_v27 }
  0x23   : > { %481 = vmatpush1.bf16.msra.mxu0 %v1232_v26 }
  0x24   : > { %1103 = vmatprep.subr.bf16.mxu0 %v1234_v29 }
  0x25   : > { %1160 = vmatpush3.bf16.msra.mxu1 %v1233_v27 }
  0x26   : > { %499 = vmatmul.mubr.bf16.vlgmr.msra.gmra.mrb[0].mxu0 %v287_v21  ;;  %1165 = vmatprep.subr.bf16.mxu1 %v1237_v33 }
  0x27   : > { %508 = vmatprep.mubr.bf16.mxu0 %v1268_v2  ;;  %1104 = vmatpush3.bf16.msra.mxu0 %v1235_v31 }
  0x28   : > { %1105 = vmatprep.subr.bf16.mxu0 %v1236_v32  ;;  %1162 = vmatmul.mubr.bf16.vlgmr.msra.gmra.mrb[0].mxu1 %v288_v34 }
  0x29   : > { %1166 = vmatpush3.bf16.msra.mxu1 %v1237_v33 }
  0x2a   : > { %1167 = vmatprep.subr.bf16.mxu1 %v1240_v36 }
  0x2b   : > { %1106 = vmatpush3.bf16.msra.mxu0 %v1238_v35 }
  0x2c   : > { %1107 = vmatprep.subr.bf16.mxu0 %v1239_v37 }
  0x2d   : > { %1168 = vmatpush3.bf16.msra.mxu1 %v1240_v36 }
  0x2e   : > { %509 = vmatmul.mubr.bf16.gmra.mrb[4].mxu0 %v288_v34  ;;  %1169 = vmatprep.subr.bf16.mxu1 %v1243_v39 }
  0x2f   : > { %1108 = vmatpush3.bf16.msra.mxu0 %v1241_v38 }
  0x30   : > { %1109 = vmatprep.subr.bf16.mxu0 %v1242_v40 }
  0x31   : > { %1170 = vmatpush3.bf16.msra.mxu1 %v1243_v39 }
  0x32   : > { %1171 = vmatprep.subr.bf16.mxu1 %v1246_v42 }
  0x33   : > { %1110 = vmatpush3.bf16.msra.mxu0 %v1244_v41 }
  0x34   : > { %1111 = vmatprep.subr.bf16.mxu0 %v1245_v43  ;;  %v1259_v43 = vld [vmem:[%s1511_s5 + $0x8] sm:$0xff]  }
  0x35   : > { %1172 = vmatpush3.bf16.msra.mxu1 %v1246_v42  ;;  %v1258_v42 = vld [vmem:[%s1511_s5] sm:$0xff]  }
  0x36   : > { %1173 = vmatprep.subr.bf16.mxu1 %v1249_v45 }
  0x37   : > { %1112 = vmatpush3.bf16.msra.mxu0 %v1247_v44 }
  0x38   : > { %1113 = vmatprep.subr.bf16.mxu0 %v1248_v46  ;;  %v1061_v46 = vld [vmem:[%s1510_s4] ss:$0 sm:$0xff] }
  0x39   : > { %1174 = vmatpush3.bf16.msra.mxu1 %v1249_v45 }
  0x3a   : > { %1175 = vmatprep.subr.bf16.mxu1 %v1252_v49 }
  0x3b   : > { %1114 = vmatpush3.bf16.msra.mxu0 %v1250_v47 }
  0x3c   : > { %1115 = vmatprep.subr.bf16.mxu0 %v1251_v48 }
  0x3d   : > { %1176 = vmatpush3.bf16.msra.mxu1 %v1252_v49 }
  0x3e   : > { %1177 = vmatprep.subr.bf16.mxu1 %v1255_v52 }
  0x3f   : > { %1116 = vmatpush3.bf16.msra.mxu0 %v1253_v50 }
  0x40   : > { %1117 = vmatprep.subr.bf16.mxu0 %v1254_v51 }
  0x41   : > { %1178 = vmatpush3.bf16.msra.mxu1 %v1255_v52 }
  0x42   : > { %1179 = vmatprep.subr.bf16.mxu1 %v1257_v54 }
  0x43   : > { %1118 = vmatpush3.bf16.msra.mxu0 %v1256_v53 }
  0x45   : > { %1180 = vmatpush3.bf16.msra.mxu1 %v1257_v54 }
  0x46   : > { %1185 = vmatprep.subr.bf16.mxu1 %v1258_v42 }
  0xf9   : > { %v500_v63 = vpop.f32.mrb[0].mxu0 }
  0xfa   : > { %v501_v1 = vadd.f32 %v500_v63, %v326_v61  ;;  %v502_v2 = vpop.f32.mrb[1].mxu0 }
  0xfb   : > { %v503_v3 = vadd.f32 %v502_v2, %v330_v62  ;;  %v504_v4 = vpop.f32.mrb[2].mxu0  ;;  %v1163_v7 = vpop.f32.mrb[0].mxu1 }
  0xfc   : > { %v505_v5 = vadd.f32 %v504_v4, %v326_v61  ;;  %v506_v6 = vpop.f32.mrb[3].mxu0  ;;  %v562_v9 = vadd.f32 %v1163_v7, %v334_v0  ;;  %v553_v10 = vpop.f32.mrb[1].mxu1  ;;  %v568_v11 = vmax.f32 %v501_v1, 0.0 }
  0xfd   : > { %v507_v8 = vadd.f32 %v506_v6, %v330_v62  ;;  %v554_v13 = vadd.f32 %v553_v10, %v334_v0  ;;  %v1164_v14 = vpop.f32.mrb[2].mxu1  ;;  %v569_v15 = vmax.f32 %v503_v3, 0.0 }
  0xfe   : > { %v571_v12 = vmax.f32 %v505_v5, 0.0  ;;  %v576_v17 = vmax.f32 %v562_v9, 0.0  ;;  %v565_v18 = vadd.f32 %v1164_v14, %v334_v0  ;;  %v556_v19 = vpop.f32.mrb[3].mxu1 }
  0xff   : > { %v572_v16 = vmax.f32 %v507_v8, 0.0  ;;  %v570_v21 = vmax.f32 %v554_v13, 0.0  ;;  %v557_v22 = vadd.f32 %v556_v19, %v334_v0 }
 0x100   : > { %v580_v20 = vpack.c.bf16 %v571_v12, %v568_v11  ;;  %v579_v24 = vmax.f32 %v565_v18, 0.0  ;;  %v1086_v11 = vld [vmem:[%s1512_s6] ss:$0 sm:$0xff] }
 0x101   : > { %v581_v23 = vpack.c.bf16 %v572_v16, %v569_v15  ;;  %v510_v25 = vpop.f32.mrb[4].mxu0  ;;  %v573_v26 = vmax.f32 %v557_v22, 0.0 }
 0x102   : > { %v511_v27 = vadd.f32 %v510_v25, %v326_v61  ;;  %v512_v28 = vpop.f32.mrb[5].mxu0  ;;  %v585_v29 = vpack.c.bf16 %v579_v24, %v576_v17 }
 0x103   : > { %v513_v30 = vadd.f32 %v512_v28, %v330_v62  ;;  %v514_v31 = vpop.f32.mrb[6].mxu0  ;;  %817 = vmatprep.mubr.bf16.mxu0 %v581_v23  ;;  %v582_v32 = vpack.c.bf16 %v573_v26, %v570_v21 }
 0x104   : > { %v515_v33 = vadd.f32 %v514_v31, %v326_v61  ;;  %v516_v34 = vpop.f32.mrb[7].mxu0  ;;  %818 = vmatmul.mubr.bf16.vlgmr.msra.gmra.mrb[8].mxu0 %v580_v20  ;;  %v574_v36 = vmax.f32 %v511_v27, 0.0 }
 0x105   : > { %v517_v35 = vadd.f32 %v516_v34, %v330_v62  ;;  %1181 = vmatprep.mubr.bf16.mxu1 %v582_v32  ;;  %v575_v38 = vmax.f32 %v513_v30, 0.0 }
 0x106   : > { %v577_v37 = vmax.f32 %v515_v33, 0.0  ;;  %1182 = vmatmul.mubr.bf16.vlgmr.msra.gmra.mrb[4].mxu1 %v585_v29 }
 0x107   : > { %v578_v39 = vmax.f32 %v517_v35, 0.0  ;;  %1186 = vmatpush3.bf16.msra.mxu1 %v1258_v42 }
 0x108   : > { %v583_v40 = vpack.c.bf16 %v577_v37, %v574_v36  ;;  %1187 = vmatprep.subr.bf16.mxu1 %v1259_v43 }
 0x109   : > { %v584_v41 = vpack.c.bf16 %v578_v39, %v575_v38 }
 0x10b   : > { %825 = vmatprep.mubr.bf16.mxu0 %v584_v41  ;;  %1188 = vmatpush3.bf16.msra.mxu1 %v1259_v43 }
 0x10c   : > { %826 = vmatmul.mubr.bf16.gmra.mrb[12].mxu0 %v583_v40 }
 0x1d7   : > { %v1119_v44 = vpop.f32.mrb[8].mxu0 }
 0x1d8   : > { %v1120_v45 = vpop.f32.mrb[9].mxu0 }
 0x1d9   : > { %v1121_v47 = vadd.f32 %v1120_v45, %v1119_v44  ;;  %v1122_v48 = vpop.f32.mrb[10].mxu0  ;;  %v1183_v50 = vpop.f32.mrb[4].mxu1 }
 0x1da   : > { %v1123_v49 = vpop.f32.mrb[11].mxu0  ;;  %v868_v53 = vpop.f32.mrb[5].mxu1 }
 0x1db   : > { %v1124_v51 = vadd.f32 %v1123_v49, %v1122_v48  ;;  %v820_v52 = vadd.f32 %v1121_v47, %v1061_v46  ;;  %v1184_v54 = vpop.f32.mrb[6].mxu1 }
 0x1dc   : > { %v871_v57 = vpop.f32.mrb[7].mxu1 }
 0x1dd   : > { %v869_v55 = vadd.f32 %v868_v53, %v820_v52  ;;  %v823_v56 = vadd.f32 %v1124_v51, %v1061_v46 }
 0x1df   : > { %v872_v58 = vadd.f32 %v871_v57, %v823_v56  ;;  %v1125_v59 = vpop.f32.mrb[12].mxu0  ;;  %v883_v61 = vmax.f32 %v869_v55, 0.0 }
 0x1e0   : > { %v1126_v60 = vpop.f32.mrb[13].mxu0 }
 0x1e1   : > { %v884_v62 = vmax.f32 %v872_v58, 0.0  ;;  %v1127_v63 = vadd.f32 %v1126_v60, %v1125_v59  ;;  %v1128_v0 = vpop.f32.mrb[14].mxu0 }
 0x1e2   : > { %v1129_v1 = vpop.f32.mrb[15].mxu0 }
 0x1e3   : > { %v887_v2 = vpack.c.bf16 %v884_v62, %v883_v61  ;;  %v828_v3 = vadd.f32 %v1127_v63, %v1061_v46  ;;  %v1130_v4 = vadd.f32 %v1129_v1, %v1128_v0 }
 0x1e5   : > { %v877_v5 = vadd.f32 %v1183_v50, %v828_v3  ;;  %v831_v6 = vadd.f32 %v1130_v4, %v1061_v46  ;;  %1189 = vmatprep.mubr.msk.bf16.mxu1 %vm912_vm0, %v887_v2 }
 0x1e7   : > { %v880_v7 = vadd.f32 %v1184_v54, %v831_v6  ;;  %v885_v8 = vmax.f32 %v877_v5, 0.0 }
 0x1e9   : > { %v886_v9 = vmax.f32 %v880_v7, 0.0 }
 0x1eb   : > { %v888_v10 = vpack.c.bf16 %v886_v9, %v885_v8 }
 0x1ed   : > { %1190 = vmatmul.mubr.msk.bf16.vlgmr.msra.gmra.mrb[8].mxu1 %vm912_vm0, %v888_v10 }
 0x2c0   : > { %v1191_v12 = vpop.f32.mrb[8].mxu1 }
 0x2c1   : > { %v953_v13 = vpop.f32.mrb[9].mxu1  ;;  %v962_v18 = vadd.f32 %v1191_v12, %v1086_v11 }
 0x2c2   : > { %v954_v14 = vadd.f32 %v1086_v11, %v953_v13  ;;  %v1192_v15 = vpop.f32.mrb[10].mxu1 }
 0x2c3   : > { %v956_v16 = vpop.f32.mrb[11].mxu1  ;;  %v965_v19 = vadd.f32 %v1192_v15, %v1086_v11  ;;  %970 = vst.msk [vmem:[%s280_s16 + $0x10] sm:$0xff] %vm912_vm0, %v962_v18 }
 0x2c4   : > { %968 = vst.msk [vmem:[%s280_s16] sm:$0xff] %vm912_vm0, %v954_v14  ;;  %v957_v17 = vadd.f32 %v1086_v11, %v956_v16 }
 0x2c5   : > { %971 = vst.msk [vmem:[%s280_s16 + $0x18] sm:$0xff] %vm912_vm0, %v965_v19 }
 0x2c6   : > { %969 = vst.msk [vmem:[%s280_s16 + $0x8] sm:$0xff] %vm912_vm0, %v957_v17 }
 0x2c7 PF: > { %s17_s24 = sadd.s32 1, %s1266_s24  }
 0x2c8   : > { %p14_p4 = scmp.ge.s32.totalorder %s17_s24, 4  }
 0x2ca   :  { %16 = sbr.rel (!%p14_p4) target bundleno = 1 (0x1), region = 78 }

</bundles_post_ra>
